<compile_context>
chip_gen: v7x
topology: tpu7x:2x2x1
jax: 0.10.0
libtpu: 0.0.40
codegen_flags: <defaults>
</compile_context>

<pallas_src>
import functools
import math

import jax
import jax.numpy as jnp
from jax.experimental import pallas as pl
from jax.experimental.pallas import tpu as pltpu

_BN_EPS = 1e-5


def _vmem_limit_bytes():
    cap = 64 * 1024 * 1024
    try:
        info = pltpu.get_tpu_info()
        cap = int(getattr(info, "vmem_capacity_bytes", cap))
    except Exception:
        pass
    return int(min(cap * 3 // 4, 48 * 1024 * 1024))


_VMEM_LIMIT = _vmem_limit_bytes()


# --------------------------------------------------------------------------- #
# Pallas kernels
# --------------------------------------------------------------------------- #
def _mm_kernel(a_ref, b_ref, s_ref, o_ref, acc_ref, *, relu):
    k = pl.program_id(2)

    @pl.when(k == 0)
    def _():
        acc_ref[...] = jnp.zeros_like(acc_ref)

    acc_ref[...] += jnp.dot(a_ref[...], b_ref[...],
                            preferred_element_type=jnp.float32)

    @pl.when(k == pl.num_programs(2) - 1)
    def _():
        acc = acc_ref[...] + s_ref[...]
        if relu:
            acc = jnp.maximum(acc, 0.0)
        o_ref[...] = acc.astype(o_ref.dtype)


def _mm_res_kernel(a_ref, b_ref, s_ref, r_ref, o_ref, acc_ref, *, relu):
    k = pl.program_id(2)

    @pl.when(k == 0)
    def _():
        acc_ref[...] = jnp.zeros_like(acc_ref)

    acc_ref[...] += jnp.dot(a_ref[...], b_ref[...],
                            preferred_element_type=jnp.float32)

    @pl.when(k == pl.num_programs(2) - 1)
    def _():
        acc = acc_ref[...] + s_ref[...] + r_ref[...].astype(jnp.float32)
        if relu:
            acc = jnp.maximum(acc, 0.0)
        o_ref[...] = acc.astype(o_ref.dtype)


def _max9_kernel(x_ref, o_ref):
    o_ref[...] = jnp.max(x_ref[...], axis=0)


# --------------------------------------------------------------------------- #
# Padding / im2col helpers (glue, traced inside jit)
# --------------------------------------------------------------------------- #
def _round_up(x, m):
    return ((x + m - 1) // m) * m


def _pad_to(x, targets, value=0.0):
    widths = [(0, t - s) for s, t in zip(x.shape, targets)]
    if all(w == (0, 0) for w in widths):
        return x
    return jnp.pad(x, widths, constant_values=value)


def _matmul_bias_act(a, b, bias, residual, relu, out_dtype=jnp.bfloat16):
    """out = a @ b + bias [+ residual] (+ReLU). bf16 MXU inputs, f32 accumulate."""
    m, k = a.shape
    n = b.shape[1]

    # tile sizes: lane/sublane aligned, K tiled so VMEM footprint stays small
    mp = _round_up(m, 16)
    bm = 256 if mp > 256 else mp
    mp = _round_up(mp, bm)
    np_ = _round_up(n, 128)
    bn = 512 if np_ > 512 else np_
    np_ = _round_up(np_, bn)
    kp = _round_up(k, 128)
    if kp <= 1024:
        tk = kp
    else:
        tk = 512
        kp = _round_up(kp, tk)

    a = _pad_to(a.astype(jnp.bfloat16), (mp, kp))
    b = _pad_to(b.astype(jnp.bfloat16), (kp, np_))
    bias = _pad_to(bias.astype(jnp.float32).reshape(1, -1), (1, np_))

    in_specs = [
        pl.BlockSpec((bm, tk), lambda i, j, kk: (i, kk)),
        pl.BlockSpec((tk, bn), lambda i, j, kk: (kk, j)),
        pl.BlockSpec((1, bn), lambda i, j, kk: (0, j)),
    ]
    args = [a, b, bias]
    if residual is not None:
        residual = _pad_to(residual.astype(jnp.bfloat16), (mp, np_))
        in_specs.append(pl.BlockSpec((bm, bn), lambda i, j, kk: (i, j)))
        args.append(residual)
        kernel = functools.partial(_mm_res_kernel, relu=relu)
    else:
        kernel = functools.partial(_mm_kernel, relu=relu)

    out = pl.pallas_call(
        kernel,
        out_shape=jax.ShapeDtypeStruct((mp, np_), out_dtype),
        grid=(mp // bm, np_ // bn, kp // tk),
        in_specs=in_specs,
        out_specs=pl.BlockSpec((bm, bn), lambda i, j, kk: (i, j)),
        scratch_shapes=[pltpu.VMEM((bm, bn), jnp.float32)],
        compiler_params=pltpu.CompilerParams(
            dimension_semantics=("parallel", "parallel", "arbitrary"),
            vmem_limit_bytes=_VMEM_LIMIT,
        ),
    )(*args)
    return out[:m, :n]


def _im2col(x, kh, kw, stride, pad):
    n, h, w, c = x.shape
    if pad:
        x = jnp.pad(x, ((0, 0), (pad, pad), (pad, pad), (0, 0)))
    hp, wp = h + 2 * pad, w + 2 * pad
    oh = (hp - kh) // stride + 1
    ow = (wp - kw) // stride + 1
    cols = []
    for di in range(kh):
        for dj in range(kw):
            cols.append(
                x[:, di:di + (oh - 1) * stride + 1:stride,
                  dj:dj + (ow - 1) * stride + 1:stride, :])
    a = jnp.stack(cols, axis=3)  # (n, oh, ow, kh*kw, c)
    return a.reshape(n * oh * ow, kh * kw * c), (n, oh, ow)


# --------------------------------------------------------------------------- #
# Fused conv(+BN-folded) [+res] [+ReLU] and stem max-pool
# --------------------------------------------------------------------------- #
@functools.partial(jax.jit, static_argnames=("kh", "kw", "stride", "pad", "relu"))
def conv_unit(x, wmat, bias, residual, *, kh, kw, stride, pad, relu):
    """wmat is the BN-folded (kh*kw*cin, cout) bf16 matrix; bias f32 (cout,)."""
    n, h, w, c = x.shape
    cout = wmat.shape[1]
    if kh == 1 and kw == 1 and pad == 0:
        xs = x[:, ::stride, ::stride, :] if stride > 1 else x
        oh, ow = xs.shape[1], xs.shape[2]
        a = xs.reshape(n * oh * ow, c)
    else:
        a, (n, oh, ow) = _im2col(x, kh, kw, stride, pad)
    res = None if residual is None else residual.reshape(n * oh * ow, cout)
    out = _matmul_bias_act(a, wmat, bias, res, relu)
    return out.reshape(n, oh, ow, cout)


@jax.jit
def maxpool3x3_s2_ceil(x):
    """3x3 / stride-2 max pool, pad=0, ceil_mode=True (caffe ResNet stem)."""
    n, h, w, c = x.shape
    oh = -(-(h - 3) // 2) + 1
    ow = -(-(w - 3) // 2) + 1
    neg = float(jnp.finfo(x.dtype).min)
    x = jnp.pad(x, ((0, 0), (0, (oh - 1) * 2 + 3 - h),
                    (0, (ow - 1) * 2 + 3 - w), (0, 0)), constant_values=neg)
    cols = []
    for di in range(3):
        for dj in range(3):
            cols.append(x[:, di:di + (oh - 1) * 2 + 1:2,
                          dj:dj + (ow - 1) * 2 + 1:2, :])
    m = n * oh * ow
    stacked = jnp.stack(cols, 0).reshape(9, m, c)

    mp = _round_up(m, 16)
    bm = 512 if mp > 512 else mp
    mp = _round_up(mp, bm)
    cp = _round_up(c, 128)
    stacked = _pad_to(stacked, (9, mp, cp), value=neg)

    out = pl.pallas_call(
        _max9_kernel,
        out_shape=jax.ShapeDtypeStruct((mp, cp), x.dtype),
        grid=(mp // bm,),
        in_specs=[pl.BlockSpec((9, bm, cp), lambda i: (0, i, 0))],
        out_specs=pl.BlockSpec((bm, cp), lambda i: (i, 0)),
        compiler_params=pltpu.CompilerParams(
            dimension_semantics=("parallel",),
            vmem_limit_bytes=_VMEM_LIMIT,
        ),
    )(stacked)
    return out[:m, :c].reshape(n, oh, ow, c)


# --------------------------------------------------------------------------- #
# Deterministic synthetic ResNet-152 parameters (BN pre-folded at build time)
# --------------------------------------------------------------------------- #
def _make_conv(key, cout, cin, k):
    fan_in = cin * k * k
    return jax.random.normal(key, (cout, cin, k, k), jnp.float32) * math.sqrt(2.0 / fan_in)


def _make_bn(key, c):
    k0, k1, k2, k3 = jax.random.split(key, 4)
    return dict(
        gamma=0.5 + 0.05 * jax.random.normal(k0, (c,), jnp.float32),
        beta=0.05 * jax.random.normal(k1, (c,), jnp.float32),
        mean=0.05 * jax.random.normal(k2, (c,), jnp.float32),
        var=1.0 + 0.1 * jax.random.uniform(k3, (c,), jnp.float32),
    )


def _fold_conv_bn(w, bn):
    """Fold inference BN into the conv weight once: returns matmul-ready params."""
    cout, cin, kh, kw = w.shape
    scale = bn["gamma"] * jax.lax.rsqrt(bn["var"] + _BN_EPS)
    wmat = jnp.transpose(w, (2, 3, 1, 0)).reshape(kh * kw * cin, cout) * scale[None, :]
    bias = bn["beta"] - bn["mean"] * scale
    return dict(w=wmat.astype(jnp.bfloat16), b=bias.astype(jnp.float32), k=(kh, kw))


def _make_unit(key, cout, cin, k):
    kw_, kb = jax.random.split(key)
    return _fold_conv_bn(_make_conv(kw_, cout, cin, k), _make_bn(kb, cout))


def _make_bottleneck(key, inplanes, planes, stride, with_downsample):
    keys = jax.random.split(key, 4)
    blk = dict(
        stride=stride,
        conv1=_make_unit(keys[0], planes, inplanes, 1),
        conv2=_make_unit(keys[1], planes, planes, 3),
        conv3=_make_unit(keys[2], planes * 4, planes, 1),
    )
    if with_downsample:
        blk["downsample"] = _make_unit(keys[3], planes * 4, inplanes, 1)
    return blk


def make_resnet152_params(key):
    # ResNet-152 bottleneck config: [3, 8, 36, 3]
    layers_cfg = [(64, 3, 1), (128, 8, 2), (256, 36, 2), (512, 3, 2)]
    k_stem, *k_layers = jax.random.split(key, 5)
    params = dict(conv1=_make_unit(k_stem, 64, 3, 7))
    inplanes = 64
    for (planes, nblocks, stride), k_layer, name in zip(
            layers_cfg, k_layers, ("layer1", "layer2", "layer3", "layer4")):
        bkeys = jax.random.split(k_layer, nblocks)
        blocks = [_make_bottleneck(bkeys[0], inplanes, planes, stride, True)]
        inplanes = planes * 4
        for i in range(1, nblocks):
            blocks.append(_make_bottleneck(bkeys[i], inplanes, planes, 1, False))
        params[name] = blocks
    return params


# --------------------------------------------------------------------------- #
# Forward pass == Net.forward (returns the layer4 hook buffer)
# --------------------------------------------------------------------------- #
def _apply_unit(x, unit, stride, pad, relu, residual=None):
    kh, kw = unit["k"]
    return conv_unit(x, unit["w"], unit["b"], residual,
                     kh=kh, kw=kw, stride=stride, pad=pad, relu=relu)


def _bottleneck_forward(x, blk):
    s = blk["stride"]
    identity = x
    # caffe-style bottleneck: stride lives on the first 1x1 conv
    out = _apply_unit(x, blk["conv1"], s, 0, True)
    out = _apply_unit(out, blk["conv2"], 1, 1, True)
    if "downsample" in blk:
        identity = _apply_unit(x, blk["downsample"], s, 0, False)
    # conv3 + BN fused with residual add and final ReLU
    out = _apply_unit(out, blk["conv3"], 1, 0, True, residual=identity)
    return out


def net_forward(params, x_nchw):
    """self.model(x); return self.buffer  (== layer4 output, NCHW)."""
    x = jnp.transpose(x_nchw, (0, 2, 3, 1)).astype(jnp.bfloat16)  # NCHW -> NHWC
    x = _apply_unit(x, params["conv1"], 2, 3, True)               # 7x7/2 conv+BN+ReLU
    x = maxpool3x3_s2_ceil(x)                                     # 3x3/2 ceil max pool
    for name in ("layer1", "layer2", "layer3", "layer4"):
        for blk in params[name]:
            x = _bottleneck_forward(x, blk)
    # avgpool / fc run after the hook in PyTorch but never touch the buffer.
    return jnp.transpose(x, (0, 3, 1, 2)).astype(jnp.float32)     # layer4 buffer, NCHW


if __name__ == "__main__":
    key = jax.random.PRNGKey(0)
    k_params, k_input = jax.random.split(key)
    params = make_resnet152_params(k_params)
    # small input: batch=2, 3 channels, 64x64 -> layer4 buffer [2, 2048, 2, 2]
    x = jax.random.normal(k_input, (2, 3, 64, 64), jnp.float32)
    out = net_forward(params, x)
    out = jax.block_until_ready(out)
    assert out.shape == (2, 2048, 2, 2), out.shape
    assert bool(jnp.all(jnp.isfinite(out)))
    print("KERNEL_OK")
</pallas_src>

<mosaic_0001>
module attributes {stable_mosaic.version = 11 : i64} {
  func.func @_mm_kernel(%arg0: i32, %arg1: i32, %arg2: i32, %arg3: memref<256x256xbf16, #tpu.memory_space<vmem>>, %arg4: memref<256x128xbf16, #tpu.memory_space<vmem>>, %arg5: memref<1x128xf32, #tpu.memory_space<vmem>>, %arg6: memref<256x128xbf16, #tpu.memory_space<vmem>>, %arg7: memref<256x128xf32, #tpu.memory_space<vmem>>) attributes {dimension_semantics = [#tpu.dimension_semantics<parallel>, #tpu.dimension_semantics<parallel>, #tpu.dimension_semantics<arbitrary>], iteration_bounds = array<i64: 8, 1, 1>, scalar_prefetch = 0 : i64, scratch_operands = 1 : i64, tpu.core_type = #tpu.core_type<tc>, window_params = [{transform_indices = @transform_0, window_bounds = array<i64: 256, 256>}, {transform_indices = @transform_1, window_bounds = array<i64: 256, 128>}, {transform_indices = @transform_2, window_bounds = array<i64: 1, 128>}, {transform_indices = @transform_3, window_bounds = array<i64: 256, 128>}]} {
    %c0_i32 = arith.constant 0 : i32
    %0 = arith.cmpi eq, %arg2, %c0_i32 : i32
    %1 = arith.extui %0 : i1 to i32
    %c0_i32_0 = arith.constant 0 : i32
    %2 = arith.cmpi ne, %1, %c0_i32_0 : i32
    scf.if %2 {
      %cst_10 = arith.constant 0.000000e+00 : f32
      %12 = vector.broadcast %cst_10 : f32 to vector<256x128xf32>
      %c0_11 = arith.constant 0 : index
      %c0_12 = arith.constant 0 : index
      %13 = vector.load %arg7[%c0_11, %c0_12] : memref<256x128xf32, #tpu.memory_space<vmem>>, vector<256x128xf32>
      tpu.vector_store %arg7[%c0_11, %c0_12], %12 {strides = array<i32>} : memref<256x128xf32, #tpu.memory_space<vmem>>, vector<256x128xf32>,
    } else {
    }
    %c0 = arith.constant 0 : index
    %c0_1 = arith.constant 0 : index
    %3 = vector.load %arg7[%c0, %c0_1] : memref<256x128xf32, #tpu.memory_space<vmem>>, vector<256x128xf32>
    %c0_2 = arith.constant 0 : index
    %c0_3 = arith.constant 0 : index
    %4 = vector.load %arg3[%c0_2, %c0_3] : memref<256x256xbf16, #tpu.memory_space<vmem>>, vector<256x256xbf16>
    %c0_4 = arith.constant 0 : index
    %c0_5 = arith.constant 0 : index
    %5 = vector.load %arg4[%c0_4, %c0_5] : memref<256x128xbf16, #tpu.memory_space<vmem>>, vector<256x128xbf16>
    %cst = arith.constant dense<0.000000e+00> : vector<256x128xf32>
    %6 = tpu.matmul %4, %5, %cst {dimension_numbers = #tpu.dot_dimension_numbers<[1], [0], [0], [1], [0, 0, 1, 1], [], []>} : vector<256x256xbf16>, vector<256x128xbf16>, vector<256x128xf32> -> vector<256x128xf32>
    %7 = arith.addf %3, %6 : vector<256x128xf32>
    %c0_6 = arith.constant 0 : index
    %c0_7 = arith.constant 0 : index
    %8 = vector.load %arg7[%c0_6, %c0_7] : memref<256x128xf32, #tpu.memory_space<vmem>>, vector<256x128xf32>
    tpu.vector_store %arg7[%c0_6, %c0_7], %7 {strides = array<i32>} : memref<256x128xf32, #tpu.memory_space<vmem>>, vector<256x128xf32>,
    %c0_i32_8 = arith.constant 0 : i32
    %9 = arith.cmpi eq, %arg2, %c0_i32_8 : i32
    %10 = arith.extui %9 : i1 to i32
    %c0_i32_9 = arith.constant 0 : i32
    %11 = arith.cmpi ne, %10, %c0_i32_9 : i32
    scf.if %11 {
      %c0_10 = arith.constant 0 : index
      %c0_11 = arith.constant 0 : index
      %12 = vector.load %arg7[%c0_10, %c0_11] : memref<256x128xf32, #tpu.memory_space<vmem>>, vector<256x128xf32>
      %c0_12 = arith.constant 0 : index
      %c0_13 = arith.constant 0 : index
      %13 = vector.load %arg5[%c0_12, %c0_13] : memref<1x128xf32, #tpu.memory_space<vmem>>, vector<1x128xf32>
      %14 = vector.broadcast %13 : vector<1x128xf32> to vector<256x128xf32>
      %15 = arith.addf %12, %14 : vector<256x128xf32>
      %cst_14 = arith.constant 0.000000e+00 : f32
      %16 = vector.broadcast %cst_14 : f32 to vector<256x128xf32>
      %17 = arith.maximumf %15, %16 : vector<256x128xf32>
      %18 = arith.truncf %17 : vector<256x128xf32> to vector<256x128xbf16>
      %c0_15 = arith.constant 0 : index
      %c0_16 = arith.constant 0 : index
      %19 = vector.load %arg6[%c0_15, %c0_16] : memref<256x128xbf16, #tpu.memory_space<vmem>>, vector<256x128xbf16>
      tpu.vector_store %arg6[%c0_15, %c0_16], %18 {strides = array<i32>} : memref<256x128xbf16, #tpu.memory_space<vmem>>, vector<256x128xbf16>,
    } else {
    }
    return
  }
  func.func @transform_0(%arg0: i32, %arg1: i32, %arg2: i32) -> (i32, i32) {
    %c0_i32 = arith.constant 0 : i32
    return %arg0, %arg2 : i32, i32
  }
  func.func @transform_1(%arg0: i32, %arg1: i32, %arg2: i32) -> (i32, i32) {
    %c0_i32 = arith.constant 0 : i32
    return %arg2, %arg1 : i32, i32
  }
  func.func @transform_2(%arg0: i32, %arg1: i32, %arg2: i32) -> (i32, i32) {
    %c0_i32 = arith.constant 0 : i32
    %c0_i32_0 = arith.constant 0 : i32
    return %c0_i32, %arg1 : i32, i32
  }
  func.func @transform_3(%arg0: i32, %arg1: i32, %arg2: i32) -> (i32, i32) {
    %c0_i32 = arith.constant 0 : i32
    return %arg0, %arg1 : i32, i32
  }
}

</mosaic_0001>

<bundles_post_ra>
// kernel: conv_unit.1
= control target key start
LH: loop header
LB: loop body
LE: loop exit
PB: predicated region body
PF: predicated region fallthrough
CT: control target
= control target key end

     0   :  { %8 = vsyncpa [#allocation4], 0  ;;  %s2099_s0 = inlined_call_operand.vmem [shape: bf16[2048,256], index: 0, kind: input, shape index: {}]   ;;  %s2100_s1 = inlined_call_operand.vmem [shape: bf16[256,128], index: 1, kind: input, shape index: {}]   ;;  %s2101_s2 = inlined_call_operand.vmem [shape: f32[1,128], index: 2, kind: input, shape index: {}]   ;;  %s2102_s3 = inlined_call_operand.hbm [shape: bf16[2048,128], index: 3, kind: output, shape index: {}]  }
   0x1   :  { %10 = vsyncpa [#allocation4 + $0x1], 0  ;;  %s1843_s12 = smov 0   ;;  %s1845_s13 = smov 0  }
   0x2   :  { %s1847_s14 = smov 0   ;;  %s1849_s15 = smov 0  }
   0x3   :  { %s1851_s16 = smov 0   ;;  %s1853_s17 = smov 0  }
   0x4 LB: > { %s1265_s18 = sadd.s32 4294967295, %s1818_s17   ;;  %s1266_s19 = sadd.s32 4294967294, %s1818_s17   ;;  %s1818_s17 = sphi %s1853_s17, %s16_s17   ;;  %s1814_s16 = sphi %s1851_s16, %s2109_s16   ;;  %s1810_s15 = sphi %s1849_s15, %s2108_s15   ;;  %s1806_s14 = sphi %s1847_s14, %s2107_s14   ;;  %s1802_s13 = sphi %s1845_s13, %s2106_s13   ;;  %s1798_s12 = sphi %s1843_s12, %s2105_s12  }
   0x5   : > { %s35_s20 = sadd.s32 1, %s1814_s16  ;;  %s126_s21 = sadd.s32 1, %s1806_s14 }
   0x6   : > { %p37_p0 = scmp.ge.s32.totalorder %s35_s20, 8  ;;  %p136_p1 = scmp.ne.s32.totalorder %s1806_s14, %s1802_s13 }
   0x7   : > { %p137_p2 = scmp.eq.s32.totalorder %s1265_s18, 7  ;;  %p142_p3 = scmp.ne.s32.totalorder %s1802_s13, %s1798_s12 }
   0x8   : > { %s2111_s20 = smov (%p37_p0, %s35_s20), 0  ;;  %p143_p5 = scmp.eq.s32.totalorder %s1266_s19, 7 }
   0x9   : > { %p1883_p4 = por %p137_p2, %p136_p1  ;;  %s121_s23 = ssub.s32 %s1814_s16, %s2111_s20 }
   0xa   : > { %p1271_p6 = scmp.ge.s32.totalorder %s1818_s17, 1  ;;  %p124_p7 = scmp.eq.s32.totalorder %s121_s23, 0 }
   0xb   : > { %p1890_p8 = por %p143_p5, %p142_p3  ;;  %p194_p9 = scmp.lt.s32.totalorder %s1818_s17, 9 }
   0xc   : > { %s1896_s25 = scalar_select %p124_p7, %s1806_s14, %s126_s21  }
   0xd   : > { %p195_p10 = pnand %p1271_p6, %p194_p9 }
   0xe   : > { %v1676_v0 = vld [vmem:[%s2100_s1 + $0x40] sm:$0xff] (!%p195_p10)   ;;  %s1273_s28 = sshll.u32 (!%p195_p10), %s1810_s15, 5  ;;  %v1678_v2 = vld [vmem:[%s2100_s1 + $0x48] sm:$0xff] (!%p195_p10)   ;;  %v1680_v4 = vld [vmem:[%s2100_s1 + $0x50] sm:$0xff] (!%p195_p10)   ;;  %s231_s6 = sand.u32 (!%p195_p10), 1, %s1802_s13  }
   0xf   : > { %198 = sbr.rel (%p195_p10) target bundleno = 342 (0x156), region = 32  ;;  %v1677_v1 = vld [vmem:[%s2100_s1] sm:$0xff] (!%p195_p10)   ;;  %1491 = vmatprep.subr.bf16.mxu0 (!%p195_p10), %v1676_v0  ;;  %1603 = vmatprep.subr.bf16.mxu1 (!%p195_p10), %v1676_v0  ;;  %v1679_v3 = vld [vmem:[%s2100_s1 + $0x8] sm:$0xff] (!%p195_p10)   ;;  %p236_p11 = scmp.lt.s32.totalorder (!%p195_p10), %s1273_s28, 255  ;;  %v1681_v5 = vld [vmem:[%s2100_s1 + $0x10] sm:$0xff] (!%p195_p10)  }
  0x10   : > { %1492 = vmatpush3.bf16.msra.mxu0 (!%p195_p10), %v1677_v1  ;;  %1611 = vmatpush3.bf16.msra.mxu1 (!%p195_p10), %v1677_v1  ;;  %v1682_v6 = vld [vmem:[%s2100_s1 + $0x58] sm:$0xff] (!%p195_p10)   ;;  %v1684_v8 = vld [vmem:[%s2100_s1 + $0x60] sm:$0xff] (!%p195_p10)   ;;  %v1686_v10 = vld [vmem:[%s2100_s1 + $0x68] sm:$0xff] (!%p195_p10)   ;;  %s1820_s19 = smov (!%p195_p10), [#allocation3]  }
  0x11   : > { %1493 = vmatprep.subr.bf16.mxu0 (!%p195_p10), %v1678_v2  ;;  %1604 = vmatprep.subr.bf16.mxu1 (!%p195_p10), %v1678_v2  ;;  %v1683_v7 = vld [vmem:[%s2100_s1 + $0x18] sm:$0xff] (!%p195_p10)   ;;  %v1685_v9 = vld [vmem:[%s2100_s1 + $0x20] sm:$0xff] (!%p195_p10)   ;;  %v1687_v13 = vld [vmem:[%s2100_s1 + $0x28] sm:$0xff] (!%p195_p10)   ;;  %s1744_s21 = sshll.u32 (!%p195_p10), %s1820_s19, 4  ;;  %s1745_s21 = int_to_ptr.vmem [resolvable:$false] %s1744_s21 }
  0x12   : > { %v1688_v14 = vld [vmem:[%s2100_s1 + $0x70] sm:$0xff] (!%p195_p10)   ;;  %v1690_v16 = vld [vmem:[%s2100_s1 + $0x78] sm:$0xff] (!%p195_p10)   ;;  %v1987_v51 = vld [vmem:[%s2101_s2] ss:$0 sm:$0xff] (!%p195_p10)  ;;  %s1746_s23 = scalar_lea.vmem (!%p195_p10), %s1745_s21, 4096 }
  0x13   : > { %v1689_v15 = vld [vmem:[%s2100_s1 + $0x30] sm:$0xff] (!%p195_p10)   ;;  %v1691_v17 = vld [vmem:[%s2100_s1 + $0x38] sm:$0xff] (!%p195_p10)  }
  0x14   : > { %1494 = vmatpush3.bf16.msra.mxu0 (!%p195_p10), %v1679_v3  ;;  %1612 = vmatpush3.bf16.msra.mxu1 (!%p195_p10), %v1679_v3 }
  0x15   : > { %1495 = vmatprep.subr.bf16.mxu0 (!%p195_p10), %v1680_v4  ;;  %1605 = vmatprep.subr.bf16.mxu1 (!%p195_p10), %v1680_v4 }
  0x16   : > { %s2113_s28 = smov (!%p236_p11, %s1273_s28), 255 }
  0x17   : > { %s1362_s26 = sshll.u32 %s2113_s28, 3  ;;  %s1395_s28 = sshll.u32 %s1810_s15, 11 }
  0x18   : > { %1496 = vmatpush3.bf16.msra.mxu0 %v1681_v5  ;;  %1613 = vmatpush3.bf16.msra.mxu1 %v1681_v5  ;;  %s1929_s5 = scalar_lea.vmem %s2099_s0, %s1362_s26  ;;  %s2045_s11 = scalar_lea.hbm %s2102_s3, %s1395_s28 }
  0x19   : > { %1497 = vmatprep.subr.bf16.mxu0 %v1682_v6  ;;  %1606 = vmatprep.subr.bf16.mxu1 %v1682_v6  ;;  %v1694_v11 = vld [vmem:[%s1929_s5 + $0x4] ss:$8 sps:$4 sm:$0xff]   ;;  %v1692_v18 = vld [vmem:[%s1929_s5] ss:$8 sps:$4 sm:$0xff]   ;;  %v1698_v20 = vld [vmem:[%s1929_s5 + $0x14] ss:$8 sps:$4 sm:$0xff]  }
  0x1a   : > { %v1697_v12 = vld [vmem:[%s1929_s5 + $0x84] ss:$8 sps:$4 sm:$0xff]   ;;  %680 = vmatprep.mubr.bf16.mxu0 %v1694_v11  ;;  %v1695_v19 = vld [vmem:[%s1929_s5 + $0x80] ss:$8 sps:$4 sm:$0xff]   ;;  %v1700_v21 = vld [vmem:[%s1929_s5 + $0x94] ss:$8 sps:$4 sm:$0xff]  }
  0x1b   : > { %744 = vmatprep.mubr.bf16.mxu1 %v1697_v12  ;;  %v1702_v22 = vld [vmem:[%s1929_s5 + $0x10] ss:$8 sps:$4 sm:$0xff]   ;;  %v1704_v24 = vld [vmem:[%s1929_s5 + $0x24] ss:$8 sps:$4 sm:$0xff]   ;;  %v1708_v26 = vld [vmem:[%s1929_s5 + $0x20] ss:$8 sps:$4 sm:$0xff]  }
  0x1c   : > { %1498 = vmatpush3.bf16.msra.mxu0 %v1683_v7  ;;  %1614 = vmatpush3.bf16.msra.mxu1 %v1683_v7  ;;  %v1703_v23 = vld [vmem:[%s1929_s5 + $0x90] ss:$8 sps:$4 sm:$0xff]   ;;  %v1706_v25 = vld [vmem:[%s1929_s5 + $0xa4] ss:$8 sps:$4 sm:$0xff]   ;;  %v1709_v27 = vld [vmem:[%s1929_s5 + $0xa0] ss:$8 sps:$4 sm:$0xff]  }
  0x1d   : > { %1499 = vmatprep.subr.bf16.mxu0 %v1684_v8  ;;  %1607 = vmatprep.subr.bf16.mxu1 %v1684_v8  ;;  %v1710_v28 = vld [vmem:[%s1929_s5 + $0x34] ss:$8 sps:$4 sm:$0xff]   ;;  %v1714_v30 = vld [vmem:[%s1929_s5 + $0x30] ss:$8 sps:$4 sm:$0xff]   ;;  %v1716_v32 = vld [vmem:[%s1929_s5 + $0x44] ss:$8 sps:$4 sm:$0xff]  }
  0x1e   : > { %v1712_v29 = vld [vmem:[%s1929_s5 + $0xb4] ss:$8 sps:$4 sm:$0xff]   ;;  %v1715_v31 = vld [vmem:[%s1929_s5 + $0xb0] ss:$8 sps:$4 sm:$0xff]   ;;  %v1718_v33 = vld [vmem:[%s1929_s5 + $0xc4] ss:$8 sps:$4 sm:$0xff]  }
  0x1f   : > { %v1720_v34 = vld [vmem:[%s1929_s5 + $0x40] ss:$8 sps:$4 sm:$0xff]   ;;  %v1722_v36 = vld [vmem:[%s1929_s5 + $0x54] ss:$8 sps:$4 sm:$0xff]   ;;  %v1726_v38 = vld [vmem:[%s1929_s5 + $0x50] ss:$8 sps:$4 sm:$0xff]  }
  0x20   : > { %1500 = vmatpush3.bf16.msra.mxu0 %v1685_v9  ;;  %1615 = vmatpush3.bf16.msra.mxu1 %v1685_v9  ;;  %v1721_v35 = vld [vmem:[%s1929_s5 + $0xc0] ss:$8 sps:$4 sm:$0xff]   ;;  %v1724_v37 = vld [vmem:[%s1929_s5 + $0xd4] ss:$8 sps:$4 sm:$0xff]   ;;  %v1727_v39 = vld [vmem:[%s1929_s5 + $0xd0] ss:$8 sps:$4 sm:$0xff]  }
  0x21   : > { %1501 = vmatprep.subr.bf16.mxu0 %v1686_v10  ;;  %1608 = vmatprep.subr.bf16.mxu1 %v1686_v10  ;;  %v1728_v40 = vld [vmem:[%s1929_s5 + $0x64] ss:$8 sps:$4 sm:$0xff]   ;;  %v1732_v42 = vld [vmem:[%s1929_s5 + $0x60] ss:$8 sps:$4 sm:$0xff]   ;;  %v1734_v44 = vld [vmem:[%s1929_s5 + $0x74] ss:$8 sps:$4 sm:$0xff]  }
  0x22   : > { %v1730_v41 = vld [vmem:[%s1929_s5 + $0xe4] ss:$8 sps:$4 sm:$0xff]   ;;  %v1733_v43 = vld [vmem:[%s1929_s5 + $0xe0] ss:$8 sps:$4 sm:$0xff]   ;;  %v1736_v45 = vld [vmem:[%s1929_s5 + $0xf4] ss:$8 sps:$4 sm:$0xff]  }
  0x23   : > { %v1738_v46 = vld [vmem:[%s1929_s5 + $0x70] ss:$8 sps:$4 sm:$0xff]   ;;  %s2053_s15 = scalar_lea.sflag [#allocation4], %s231_s6 }
  0x24   : > { %1502 = vmatpush3.bf16.msra.mxu0 %v1687_v13  ;;  %1616 = vmatpush3.bf16.msra.mxu1 %v1687_v13  ;;  %v1739_v47 = vld [vmem:[%s1929_s5 + $0xf0] ss:$8 sps:$4 sm:$0xff]   ;;  %s1272_s5 = sshll.u32 %s231_s6, 7 }
  0x25   : > { %1503 = vmatprep.subr.bf16.mxu0 %v1688_v14  ;;  %1609 = vmatprep.subr.bf16.mxu1 %v1688_v14  ;;  %s1996_s7 = scalar_lea.vmem [#allocation3], %s1272_s5 }
  0x26   : > { %s1154_s8 = sshll.u32 %s1996_s7, 4  ;;  %s2047_s8 = int_to_ptr.vmem [resolvable:$true] %s1154_s8 }
  0x27   : > { %s1740_s18 = scalar_lea.vmem %s2047_s8, 2048  ;;  %p1747_p1 = scmp.lt.s32.totalorder %s2047_s8, %s1745_s21 }
  0x28   : > { %1504 = vmatpush3.bf16.msra.mxu0 %v1689_v15  ;;  %1617 = vmatpush3.bf16.msra.mxu1 %v1689_v15  ;;  %p1741_p12 = scmp.ne.s32.totalorder %s2047_s8, %s1740_s18  ;;  %p1748_p2 = scmp.lt.s32.totalorder %s1746_s23, %s1740_s18 }
  0x29   : > { %1505 = vmatprep.subr.bf16.mxu0 %v1690_v16  ;;  %1610 = vmatprep.subr.bf16.mxu1 %v1690_v16 }
  0x2a   : > { %p1742_p13 = pnand %p1741_p12, %p1883_p4  ;;  %p1749_p3 = por %p1748_p2, %p1747_p1 }
  0x2c   : > { %1506 = vmatpush3.bf16.msra.mxu0 %v1691_v17  ;;  %1618 = vmatpush3.bf16.msra.mxu1 %v1691_v17  ;;  %p1743_p0 = pneg %p1742_p13 }
  0x2e   : > { %p1750_p5 = pnand %p1749_p3, %p1743_p0 }
  0x2f   : > { %681 = vmatmul.mubr.bf16.vlgmr.msra.gmra.mrb[0].mxu0 %v1692_v18  ;;  %745 = vmatmul.mubr.bf16.vlgmr.msra.gmra.mrb[0].mxu1 %v1695_v19 }
  0x30   : > { %688 = vmatprep.mubr.bf16.mxu0 %v1698_v20  ;;  %752 = vmatprep.mubr.bf16.mxu1 %v1700_v21 }
  0x37   : > { %689 = vmatmul.mubr.bf16.gmra.mrb[4].mxu0 %v1702_v22  ;;  %753 = vmatmul.mubr.bf16.gmra.mrb[4].mxu1 %v1703_v23 }
  0x38   : > { %696 = vmatprep.mubr.bf16.mxu0 %v1704_v24  ;;  %760 = vmatprep.mubr.bf16.mxu1 %v1706_v25 }
  0x3f   : > { %697 = vmatmul.mubr.bf16.gmra.mrb[8].mxu0 %v1708_v26  ;;  %761 = vmatmul.mubr.bf16.gmra.mrb[8].mxu1 %v1709_v27 }
  0x40   : > { %704 = vmatprep.mubr.bf16.mxu0 %v1710_v28  ;;  %768 = vmatprep.mubr.bf16.mxu1 %v1712_v29 }
  0x47   : > { %705 = vmatmul.mubr.bf16.gmra.mrb[12].mxu0 %v1714_v30  ;;  %769 = vmatmul.mubr.bf16.gmra.mrb[12].mxu1 %v1715_v31 }
  0x48   : > { %712 = vmatprep.mubr.bf16.mxu0 %v1716_v32  ;;  %776 = vmatprep.mubr.bf16.mxu1 %v1718_v33 }
  0x4f   : > { %713 = vmatmul.mubr.bf16.gmra.mrb[16].mxu0 %v1720_v34  ;;  %777 = vmatmul.mubr.bf16.gmra.mrb[16].mxu1 %v1721_v35 }
  0x50   : > { %720 = vmatprep.mubr.bf16.mxu0 %v1722_v36  ;;  %784 = vmatprep.mubr.bf16.mxu1 %v1724_v37 }
  0x57   : > { %721 = vmatmul.mubr.bf16.gmra.mrb[20].mxu0 %v1726_v38  ;;  %785 = vmatmul.mubr.bf16.gmra.mrb[20].mxu1 %v1727_v39 }
  0x58   : > { %728 = vmatprep.mubr.bf16.mxu0 %v1728_v40  ;;  %792 = vmatprep.mubr.bf16.mxu1 %v1730_v41 }
  0x5f   : > { %729 = vmatmul.mubr.bf16.gmra.mrb[24].mxu0 %v1732_v42  ;;  %793 = vmatmul.mubr.bf16.gmra.mrb[24].mxu1 %v1733_v43 }
  0x60   : > { %736 = vmatprep.mubr.bf16.mxu0 %v1734_v44  ;;  %800 = vmatprep.mubr.bf16.mxu1 %v1736_v45 }
  0x67   : > { %737 = vmatmul.mubr.bf16.gmra.mrb[28].mxu0 %v1738_v46  ;;  %801 = vmatmul.mubr.bf16.gmra.mrb[28].mxu1 %v1739_v47 }
 0x102   : > { %v1507_v48 = vpop.f32.mrb[0].mxu0  ;;  %v1555_v49 = vpop.f32.mrb[0].mxu1 }
 0x103   : > { %v1508_v50 = vpop.f32.mrb[1].mxu0  ;;  %v1556_v52 = vpop.f32.mrb[1].mxu1 }
 0x104   : > { %v1509_v53 = vadd.f32 %v1508_v50, %v1507_v48  ;;  %v1557_v54 = vadd.f32 %v1556_v52, %v1555_v49  ;;  %v1510_v55 = vpop.f32.mrb[2].mxu0  ;;  %v1558_v56 = vpop.f32.mrb[2].mxu1 }
 0x105   : > { %v1511_v57 = vpop.f32.mrb[3].mxu0  ;;  %v1559_v58 = vpop.f32.mrb[3].mxu1 }
 0x106   : > { %v915_v59 = vadd.f32 %v1509_v53, %v1987_v51  ;;  %v931_v60 = vadd.f32 %v1557_v54, %v1987_v51  ;;  %v1512_v61 = vadd.f32 %v1511_v57, %v1510_v55  ;;  %v1560_v62 = vadd.f32 %v1559_v58, %v1558_v56 }
 0x108   : > { %v916_v63 = vadd.f32 %v1512_v61, %v1987_v51  ;;  %v932_v0 = vadd.f32 %v1560_v62, %v1987_v51  ;;  %v947_v1 = vmax.f32 %v915_v59, 0.0  ;;  %v963_v2 = vmax.f32 %v931_v60, 0.0 }
 0x10a   : > { %v948_v3 = vmax.f32 %v916_v63, 0.0  ;;  %v964_v4 = vmax.f32 %v932_v0, 0.0  ;;  %v1513_v5 = vpop.f32.mrb[4].mxu0  ;;  %v1561_v6 = vpop.f32.mrb[4].mxu1 }
 0x10b   : > { %v1514_v7 = vpop.f32.mrb[5].mxu0  ;;  %v1562_v8 = vpop.f32.mrb[5].mxu1 }
 0x10c   : > { %v1399_v9 = vpack.c.bf16 %v948_v3, %v947_v1  ;;  %v1439_v10 = vpack.c.bf16 %v964_v4, %v963_v2  ;;  %v1515_v11 = vadd.f32 %v1514_v7, %v1513_v5  ;;  %v1563_v12 = vadd.f32 %v1562_v8, %v1561_v6  ;;  %v1516_v13 = vpop.f32.mrb[6].mxu0  ;;  %v1564_v14 = vpop.f32.mrb[6].mxu1 }
 0x10d   : > { %v1517_v15 = vpop.f32.mrb[7].mxu0  ;;  %v1565_v16 = vpop.f32.mrb[7].mxu1 }
 0x10e   : > { %1400 = vst [vmem:[%s1996_s7] sm:$0xff] %v1399_v9   ;;  %1483 = vst [vmem:[%s1996_s7 + $0x40] sm:$0xff] %v1439_v10   ;;  %v917_v17 = vadd.f32 %v1515_v11, %v1987_v51  ;;  %v933_v18 = vadd.f32 %v1563_v12, %v1987_v51  ;;  %v1518_v19 = vadd.f32 %v1517_v15, %v1516_v13 }
 0x10f   : > { %v1566_v20 = vadd.f32 %v1565_v16, %v1564_v14 }
 0x110   : > { %v918_v21 = vadd.f32 %v1518_v19, %v1987_v51  ;;  %v949_v23 = vmax.f32 %v917_v17, 0.0  ;;  %v965_v24 = vmax.f32 %v933_v18, 0.0 }
 0x111   : > { %v934_v22 = vadd.f32 %v1566_v20, %v1987_v51 }
 0x112   : > { %v950_v25 = vmax.f32 %v918_v21, 0.0  ;;  %v1519_v27 = vpop.f32.mrb[8].mxu0  ;;  %v1567_v28 = vpop.f32.mrb[8].mxu1 }
 0x113   : > { %v966_v26 = vmax.f32 %v934_v22, 0.0  ;;  %v1520_v29 = vpop.f32.mrb[9].mxu0  ;;  %v1568_v30 = vpop.f32.mrb[9].mxu1 }
 0x114   : > { %v1404_v31 = vpack.c.bf16 %v950_v25, %v949_v23  ;;  %v1521_v33 = vadd.f32 %v1520_v29, %v1519_v27  ;;  %v1569_v34 = vadd.f32 %v1568_v30, %v1567_v28  ;;  %v1522_v35 = vpop.f32.mrb[10].mxu0  ;;  %v1570_v36 = vpop.f32.mrb[10].mxu1 }
 0x115   : > { %v1444_v32 = vpack.c.bf16 %v966_v26, %v965_v24  ;;  %v1523_v37 = vpop.f32.mrb[11].mxu0  ;;  %v1571_v38 = vpop.f32.mrb[11].mxu1 }
 0x116   : > { %1476 = vst [vmem:[%s1996_s7 + $0x8] sm:$0xff] %v1404_v31   ;;  %v919_v39 = vadd.f32 %v1521_v33, %v1987_v51  ;;  %v935_v40 = vadd.f32 %v1569_v34, %v1987_v51  ;;  %v1524_v41 = vadd.f32 %v1523_v37, %v1522_v35  ;;  %v1572_v42 = vadd.f32 %v1571_v38, %v1570_v36 }
 0x117   : > { %1484 = vst [vmem:[%s1996_s7 + $0x48] sm:$0xff] %v1444_v32  }
 0x118   : > { %v920_v43 = vadd.f32 %v1524_v41, %v1987_v51  ;;  %v936_v44 = vadd.f32 %v1572_v42, %v1987_v51  ;;  %v951_v45 = vmax.f32 %v919_v39, 0.0  ;;  %v967_v46 = vmax.f32 %v935_v40, 0.0 }
 0x11a   : > { %v952_v47 = vmax.f32 %v920_v43, 0.0  ;;  %v968_v48 = vmax.f32 %v936_v44, 0.0  ;;  %v1525_v49 = vpop.f32.mrb[12].mxu0  ;;  %v1573_v50 = vpop.f32.mrb[12].mxu1 }
 0x11b   : > { %v1526_v52 = vpop.f32.mrb[13].mxu0  ;;  %v1574_v53 = vpop.f32.mrb[13].mxu1 }
 0x11c   : > { %v1409_v54 = vpack.c.bf16 %v952_v47, %v951_v45  ;;  %v1449_v55 = vpack.c.bf16 %v968_v48, %v967_v46  ;;  %v1527_v56 = vadd.f32 %v1526_v52, %v1525_v49  ;;  %v1575_v57 = vadd.f32 %v1574_v53, %v1573_v50  ;;  %v1528_v58 = vpop.f32.mrb[14].mxu0  ;;  %v1576_v59 = vpop.f32.mrb[14].mxu1 }
 0x11d   : > { %v1529_v60 = vpop.f32.mrb[15].mxu0  ;;  %v1577_v61 = vpop.f32.mrb[15].mxu1 }
 0x11e   : > { %1477 = vst [vmem:[%s1996_s7 + $0x10] sm:$0xff] %v1409_v54   ;;  %1485 = vst [vmem:[%s1996_s7 + $0x50] sm:$0xff] %v1449_v55   ;;  %v921_v62 = vadd.f32 %v1527_v56, %v1987_v51  ;;  %v937_v63 = vadd.f32 %v1575_v57, %v1987_v51  ;;  %v1530_v0 = vadd.f32 %v1529_v60, %v1528_v58 }
 0x11f   : > { %v1578_v1 = vadd.f32 %v1577_v61, %v1576_v59 }
 0x120   : > { %v922_v2 = vadd.f32 %v1530_v0, %v1987_v51  ;;  %v953_v4 = vmax.f32 %v921_v62, 0.0  ;;  %v969_v5 = vmax.f32 %v937_v63, 0.0 }
 0x121   : > { %v938_v3 = vadd.f32 %v1578_v1, %v1987_v51 }
 0x122   : > { %v954_v6 = vmax.f32 %v922_v2, 0.0  ;;  %v1531_v8 = vpop.f32.mrb[16].mxu0  ;;  %v1579_v9 = vpop.f32.mrb[16].mxu1 }
 0x123   : > { %v970_v7 = vmax.f32 %v938_v3, 0.0  ;;  %v1532_v10 = vpop.f32.mrb[17].mxu0  ;;  %v1580_v11 = vpop.f32.mrb[17].mxu1 }
 0x124   : > { %v1414_v12 = vpack.c.bf16 %v954_v6, %v953_v4  ;;  %v1533_v14 = vadd.f32 %v1532_v10, %v1531_v8  ;;  %v1581_v15 = vadd.f32 %v1580_v11, %v1579_v9  ;;  %v1534_v16 = vpop.f32.mrb[18].mxu0  ;;  %v1582_v17 = vpop.f32.mrb[18].mxu1 }
 0x125   : > { %v1454_v13 = vpack.c.bf16 %v970_v7, %v969_v5  ;;  %v1535_v18 = vpop.f32.mrb[19].mxu0  ;;  %v1583_v19 = vpop.f32.mrb[19].mxu1 }
 0x126   : > { %1478 = vst [vmem:[%s1996_s7 + $0x18] sm:$0xff] %v1414_v12   ;;  %v923_v20 = vadd.f32 %v1533_v14, %v1987_v51  ;;  %v939_v21 = vadd.f32 %v1581_v15, %v1987_v51  ;;  %v1536_v22 = vadd.f32 %v1535_v18, %v1534_v16  ;;  %v1584_v23 = vadd.f32 %v1583_v19, %v1582_v17 }
 0x127   : > { %1486 = vst [vmem:[%s1996_s7 + $0x58] sm:$0xff] %v1454_v13  }
 0x128   : > { %v924_v24 = vadd.f32 %v1536_v22, %v1987_v51  ;;  %v940_v25 = vadd.f32 %v1584_v23, %v1987_v51  ;;  %v955_v26 = vmax.f32 %v923_v20, 0.0  ;;  %v971_v27 = vmax.f32 %v939_v21, 0.0 }
 0x12a   : > { %v956_v28 = vmax.f32 %v924_v24, 0.0  ;;  %v972_v29 = vmax.f32 %v940_v25, 0.0  ;;  %v1537_v30 = vpop.f32.mrb[20].mxu0  ;;  %v1585_v31 = vpop.f32.mrb[20].mxu1 }
 0x12b   : > { %v1538_v32 = vpop.f32.mrb[21].mxu0  ;;  %v1586_v33 = vpop.f32.mrb[21].mxu1 }
 0x12c   : > { %v1419_v34 = vpack.c.bf16 %v956_v28, %v955_v26  ;;  %v1459_v35 = vpack.c.bf16 %v972_v29, %v971_v27  ;;  %v1539_v36 = vadd.f32 %v1538_v32, %v1537_v30  ;;  %v1587_v37 = vadd.f32 %v1586_v33, %v1585_v31  ;;  %v1540_v38 = vpop.f32.mrb[22].mxu0  ;;  %v1588_v39 = vpop.f32.mrb[22].mxu1 }
 0x12d   : > { %v1541_v40 = vpop.f32.mrb[23].mxu0  ;;  %v1589_v41 = vpop.f32.mrb[23].mxu1 }
 0x12e   : > { %1479 = vst [vmem:[%s1996_s7 + $0x20] sm:$0xff] %v1419_v34   ;;  %1487 = vst [vmem:[%s1996_s7 + $0x60] sm:$0xff] %v1459_v35   ;;  %v925_v42 = vadd.f32 %v1539_v36, %v1987_v51  ;;  %v941_v43 = vadd.f32 %v1587_v37, %v1987_v51  ;;  %v1542_v44 = vadd.f32 %v1541_v40, %v1540_v38 }
 0x12f   : > { %v1590_v45 = vadd.f32 %v1589_v41, %v1588_v39 }
 0x130   : > { %v926_v46 = vadd.f32 %v1542_v44, %v1987_v51  ;;  %v957_v48 = vmax.f32 %v925_v42, 0.0  ;;  %v973_v49 = vmax.f32 %v941_v43, 0.0 }
 0x131   : > { %v942_v47 = vadd.f32 %v1590_v45, %v1987_v51 }
 0x132   : > { %v958_v50 = vmax.f32 %v926_v46, 0.0  ;;  %v1543_v53 = vpop.f32.mrb[24].mxu0  ;;  %v1591_v54 = vpop.f32.mrb[24].mxu1 }
 0x133   : > { %v974_v52 = vmax.f32 %v942_v47, 0.0  ;;  %v1544_v55 = vpop.f32.mrb[25].mxu0  ;;  %v1592_v56 = vpop.f32.mrb[25].mxu1 }
 0x134   : > { %v1424_v57 = vpack.c.bf16 %v958_v50, %v957_v48  ;;  %v1545_v59 = vadd.f32 %v1544_v55, %v1543_v53  ;;  %v1593_v60 = vadd.f32 %v1592_v56, %v1591_v54  ;;  %v1546_v61 = vpop.f32.mrb[26].mxu0  ;;  %v1594_v62 = vpop.f32.mrb[26].mxu1 }
 0x135   : > { %v1464_v58 = vpack.c.bf16 %v974_v52, %v973_v49  ;;  %v1547_v63 = vpop.f32.mrb[27].mxu0  ;;  %v1595_v0 = vpop.f32.mrb[27].mxu1 }
 0x136   : > { %1480 = vst [vmem:[%s1996_s7 + $0x28] sm:$0xff] %v1424_v57   ;;  %v927_v1 = vadd.f32 %v1545_v59, %v1987_v51  ;;  %v943_v2 = vadd.f32 %v1593_v60, %v1987_v51  ;;  %v1548_v3 = vadd.f32 %v1547_v63, %v1546_v61  ;;  %v1596_v4 = vadd.f32 %v1595_v0, %v1594_v62 }
 0x137   : > { %1488 = vst [vmem:[%s1996_s7 + $0x68] sm:$0xff] %v1464_v58  }
 0x138   : > { %v928_v5 = vadd.f32 %v1548_v3, %v1987_v51  ;;  %v944_v6 = vadd.f32 %v1596_v4, %v1987_v51  ;;  %v959_v7 = vmax.f32 %v927_v1, 0.0  ;;  %v975_v8 = vmax.f32 %v943_v2, 0.0 }
 0x13a   : > { %v960_v9 = vmax.f32 %v928_v5, 0.0  ;;  %v976_v10 = vmax.f32 %v944_v6, 0.0  ;;  %v1549_v11 = vpop.f32.mrb[28].mxu0  ;;  %v1597_v12 = vpop.f32.mrb[28].mxu1 }
 0x13b   : > { %v1550_v13 = vpop.f32.mrb[29].mxu0  ;;  %v1598_v14 = vpop.f32.mrb[29].mxu1 }
 0x13c   : > { %v1429_v15 = vpack.c.bf16 %v960_v9, %v959_v7  ;;  %v1469_v16 = vpack.c.bf16 %v976_v10, %v975_v8  ;;  %v1551_v17 = vadd.f32 %v1550_v13, %v1549_v11  ;;  %v1599_v18 = vadd.f32 %v1598_v14, %v1597_v12  ;;  %v1552_v19 = vpop.f32.mrb[30].mxu0  ;;  %v1600_v20 = vpop.f32.mrb[30].mxu1 }
 0x13d   : > { %v1553_v21 = vpop.f32.mrb[31].mxu0  ;;  %v1601_v22 = vpop.f32.mrb[31].mxu1 }
 0x13e   : > { %1481 = vst [vmem:[%s1996_s7 + $0x30] sm:$0xff] %v1429_v15   ;;  %1489 = vst [vmem:[%s1996_s7 + $0x70] sm:$0xff] %v1469_v16   ;;  %v929_v23 = vadd.f32 %v1551_v17, %v1987_v51  ;;  %v945_v24 = vadd.f32 %v1599_v18, %v1987_v51  ;;  %v1554_v25 = vadd.f32 %v1553_v21, %v1552_v19 }
 0x13f   : > { %v1602_v26 = vadd.f32 %v1601_v22, %v1600_v20 }
 0x140   : > { %v930_v27 = vadd.f32 %v1554_v25, %v1987_v51  ;;  %v961_v29 = vmax.f32 %v929_v23, 0.0  ;;  %v977_v30 = vmax.f32 %v945_v24, 0.0 }
 0x141   : > { %v946_v28 = vadd.f32 %v1602_v26, %v1987_v51 }
 0x142   : > { %v962_v31 = vmax.f32 %v930_v27, 0.0 }
 0x143   : > { %v978_v32 = vmax.f32 %v946_v28, 0.0 }
 0x144   : > { %v1434_v33 = vpack.c.bf16 %v962_v31, %v961_v29 }
 0x145   : > { %v1474_v34 = vpack.c.bf16 %v978_v32, %v977_v30 }
 0x146   : > { %1482 = vst [vmem:[%s1996_s7 + $0x38] sm:$0xff] %v1434_v33  }
 0x147   : > { %1490 = vst [vmem:[%s1996_s7 + $0x78] sm:$0xff] %v1474_v34  }
 0x148   : > { %1753 = shalt.err (!%p1750_p5)
}
 0x149   : > { %s1754_s26 = scalar_lea.hbm %s2045_s11, 2048  ;;  %s1758_s30 = scalar_lea.hbm %s2102_s3, 16384 }
 0x14a   : > { %p1755_p6 = scmp.ne.s32.totalorder %s2045_s11, %s1754_s26  ;;  %p1759_p10 = scmp.lt.u32.totalorder %s2045_s11, %s2102_s3 }
 0x14b   : > { %p1760_p11 = scmp.lt.u32.totalorder %s1758_s30, %s1754_s26  ;;  %p1762_p13 = scmp.lt.u32.totalorder %s1754_s26, %s2045_s11 }
 0x14c   : > { %p1756_p7 = pnand %p1755_p6, %p1883_p4 }
 0x14d   : > { %p1761_p12 = por %p1760_p11, %p1759_p10 }
 0x14e   : > { %p1757_p9 = pneg %p1756_p7 }
 0x14f   : > { %p1763_p0 = por %p1762_p13, %p1761_p12 }
 0x151   : > { %p1764_p1 = pnand %p1763_p0, %p1757_p9 }
 0x153   : > { %1767 = shalt.err (!%p1764_p1)
}
 0x154   : > { %s1821_s5 = smov 64   ;;  %s1822_s7 = smov 4  }
 0x155   : > { %1619 = dma.vmem_to_hbm [thread:$0]  (%p1883_p4), %s2047_s8, 2048, %s2045_s11, %s2053_s15, %s1821_s5, %s1821_s5, %s1822_s7  }
 0x156 PF: > { %p1625_p2 = scmp.ge.s32.totalorder %s1818_s17, 2  ;;  %s1169_s28 = sand.u32 1, %s1798_s12  }
 0x157   : > { %s1170_s9 = scalar_lea.sflag [#allocation4], %s1169_s28 }
 0x158   : > { %p1622_p3 = pnand %p1625_p2, %p1890_p8 }
 0x15a   : > { %1793 = dma.done.wait (!%p1622_p3), %s1170_s9, 2048  }
 0x15b   : > { %1795 = vsyncadd (!%p1622_p3), %s1170_s9, 4294965248  ;;  %s16_s17 = sadd.s32 1, %s1818_s17   ;;  %s2105_s12 = smov %s1802_s13 }
 0x15c   : > { %p13_p5 = scmp.ge.s32.totalorder %s16_s17, 10   ;;  %s2106_s13 = smov %s1806_s14 }
 0x15d   : > { %s2107_s14 = smov %s1896_s25  ;;  %s2108_s15 = smov %s1814_s16 }
 0x15e   : > { %s2109_s16 = smov %s2111_s20  ;;  %15 = sbr.rel (!%p13_p5) target bundleno = 4 (0x4), region = 81 }
 0x165   :  { %1175 = vsyncpa [#allocation4], 1 }
 0x166   :  { %1177 = vsyncpa [#allocation4 + $0x1], 1 }

</bundles_post_ra>
